<compile_context>
chip_gen: v7x
topology: tpu7x:2x2x1
jax: 0.10.0
libtpu: 0.0.40
codegen_flags: <defaults>
</compile_context>

<pallas_src>
import functools

import jax
import jax.numpy as jnp
from jax.experimental import pallas as pl
from jax.experimental.pallas import tpu as pltpu


def _shift_flat(a, off):
    """a: (C, HW) row-major flattened image.  Returns b with
    b[:, i] = a[:, i + off], and 0 where i + off is out of [0, HW).

    With row-major flattening, a shift by off = dh*W + dw reads the (dh, dw)
    neighbour of every pixel; the zero fill at the array ends reproduces the
    conv's zero padding in the vertical (dh) direction exactly.  The horizontal
    (dw) per-row wrap is masked separately by the caller.
    """
    if off == 0:
        return a
    c, hw = a.shape
    z = jnp.zeros((c, abs(off)), a.dtype)
    if off > 0:
        return jnp.concatenate([a[:, off:], z], axis=1)
    return jnp.concatenate([z, a[:, :hw + off]], axis=1)


def _dense_layer_kernel(x_ref, scale_ref, shift_ref, w_ref, o_ref, *, width):
    # x_ref     : (1, Cin, H*W)      raw x, one image, pixels lane-dense
    # scale_ref : (Cin, 1)           folded BN scale = gamma * rsqrt(var + eps)
    # shift_ref : (Cin, 1)           folded BN shift = beta - mean * scale
    # w_ref     : (9, Cout, Cin)     conv taps, tap index t = kh*3 + kw
    # o_ref     : (1, Cin+Cout, H*W) fused DenseNet concat, NCHW-flat
    cout = w_ref.shape[1]
    hw = x_ref.shape[2]

    x = x_ref[0]                                                   # (Cin, HW)

    # Training-mode BN (folded) + ReLU, f32, on the lane-dense slab (VPU).
    act = jnp.maximum(x * scale_ref[...] + shift_ref[...], 0.0)    # (Cin, HW)

    # Per-lane pixel column index -> masks for the conv's horizontal zero padding.
    col = jax.lax.broadcasted_iota(jnp.int32, (1, hw), 1) % width
    not_first_col = col > 0            # valid when reading the left neighbour
    not_last_col = col < width - 1     # valid when reading the right neighbour

    # 3x3 conv = 9 accumulating MXU matmuls over shifted/masked activations.
    # In-kernel im2col: no patch slab ever touches HBM.
    acc = jnp.zeros((cout, hw), jnp.float32)
    for kh in range(3):
        for kw in range(3):
            dh, dw = kh - 1, kw - 1
            shifted = _shift_flat(act, dh * width + dw)
            if dw == -1:
                shifted = jnp.where(not_first_col, shifted, 0.0)
            elif dw == 1:
                shifted = jnp.where(not_last_col, shifted, 0.0)
            acc = acc + jnp.dot(w_ref[kh * 3 + kw], shifted,
                                preferred_element_type=jnp.float32)

    # Fused DenseNet concat [x, conv(relu(bn(x)))] assembled once and written
    # with a single full-block (sublane/lane aligned) store.
    o_ref[0] = jnp.concatenate([x, acc], axis=0).astype(o_ref.dtype)


def dense_layer_forward(x_nchw, gamma, beta, w_oihw, eps=1e-5):
    """x_nchw: (N, Cin, H, W) f32. Returns (N, Cin+Cout, H, W) f32."""
    N, Cin, H, W = x_nchw.shape
    Cout = w_oihw.shape[0]
    HW = H * W

    # Training-mode BatchNorm statistics (per channel, biased variance), folded.
    # (Kept in the wrapper: one fused XLA pass over x; the kernel itself reads x once.)
    mean = jnp.mean(x_nchw, axis=(0, 2, 3))
    var = jnp.var(x_nchw, axis=(0, 2, 3))
    scale_v = gamma / jnp.sqrt(var + eps)
    shift_v = beta - mean * scale_v
    scale = scale_v.reshape(Cin, 1).astype(jnp.float32)
    shift = shift_v.reshape(Cin, 1).astype(jnp.float32)

    # Conv weights OIHW -> (9, Cout, Cin); tap index t = kh*3 + kw.
    w_taps = jnp.transpose(w_oihw, (2, 3, 0, 1)).reshape(9, Cout, Cin)
    w_taps = w_taps.astype(jnp.float32)

    # Free trailing-dims reshape only (no transpose, no padding, no im2col in HBM).
    x_flat = x_nchw.reshape(N, Cin, HW)

    kernel = functools.partial(_dense_layer_kernel, width=W)

    out_flat = pl.pallas_call(
        kernel,
        out_shape=jax.ShapeDtypeStruct((N, Cin + Cout, HW), jnp.float32),
        grid=(N,),                                   # batch axis: pipelined + 2-TC shardable
        in_specs=[
            pl.BlockSpec((1, Cin, HW), lambda n: (n, 0, 0)),
            pl.BlockSpec((Cin, 1), lambda n: (0, 0)),
            pl.BlockSpec((Cin, 1), lambda n: (0, 0)),
            pl.BlockSpec((9, Cout, Cin), lambda n: (0, 0, 0)),
        ],
        out_specs=pl.BlockSpec((1, Cin + Cout, HW), lambda n: (n, 0, 0)),
        compiler_params=pltpu.CompilerParams(
            dimension_semantics=("parallel",)),
    )(x_flat, scale, shift, w_taps)

    return out_flat.reshape(N, Cin + Cout, H, W)


if __name__ == "__main__":
    # Small deterministic example consistent with the module:
    # n_channels=4, growth_rate=16, batch=2, spatial=16x16.
    N, Cin, H, W = 2, 4, 16, 16
    Cout = 16

    key = jax.random.PRNGKey(0)
    kx, kw, kg, kb = jax.random.split(key, 4)

    x = jax.random.normal(kx, (N, Cin, H, W), dtype=jnp.float32)
    # Conv2d(Cin, Cout, 3, padding=1, bias=False): weight shape (Cout, Cin, 3, 3).
    w = jax.random.normal(kw, (Cout, Cin, 3, 3), dtype=jnp.float32) * 0.1
    # BatchNorm2d(Cin) affine params (perturbed so BN is non-trivial).
    gamma = 1.0 + 0.1 * jax.random.normal(kg, (Cin,), dtype=jnp.float32)
    beta = 0.1 * jax.random.normal(kb, (Cin,), dtype=jnp.float32)

    out = dense_layer_forward(x, gamma, beta, w)
    jax.block_until_ready(out)
    assert out.shape == (N, Cin + Cout, H, W), out.shape

    # Pure-JAX f32 reference (training-mode BN -> ReLU -> 3x3 conv -> concat).
    mean = jnp.mean(x, axis=(0, 2, 3))
    var = jnp.var(x, axis=(0, 2, 3))
    act_ref = jnp.maximum(
        (x - mean[None, :, None, None]) / jnp.sqrt(var + 1e-5)[None, :, None, None]
        * gamma[None, :, None, None] + beta[None, :, None, None], 0.0)
    conv_ref = jax.lax.conv_general_dilated(
        act_ref, w, window_strides=(1, 1), padding=((1, 1), (1, 1)),
        dimension_numbers=("NCHW", "OIHW", "NCHW"))
    ref = jnp.concatenate([x, conv_ref], axis=1)
    max_err = float(jnp.max(jnp.abs(out - ref)))
    assert max_err < 2e-3, f"max abs error {max_err}"

    print("KERNEL_OK")
</pallas_src>

<mosaic_0001>
module attributes {stable_mosaic.version = 11 : i64} {
  func.func @_dense_layer_kernel(%arg0: i32, %arg1: memref<1x4x256xf32, #tpu.memory_space<vmem>>, %arg2: memref<4x1xf32, #tpu.memory_space<vmem>>, %arg3: memref<4x1xf32, #tpu.memory_space<vmem>>, %arg4: memref<9x16x4xf32, #tpu.memory_space<vmem>>, %arg5: memref<1x20x256xf32, #tpu.memory_space<vmem>>) attributes {dimension_semantics = [#tpu.dimension_semantics<parallel>], iteration_bounds = array<i64: 2>, scalar_prefetch = 0 : i64, scratch_operands = 0 : i64, tpu.core_type = #tpu.core_type<tc>, window_params = [{transform_indices = @transform_0, window_bounds = array<i64: 1, 4, 256>}, {pipeline_mode = #tpu.pipeline_mode<synchronous>, transform_indices = @transform_1, window_bounds = array<i64: 4, 1>}, {pipeline_mode = #tpu.pipeline_mode<synchronous>, transform_indices = @transform_2, window_bounds = array<i64: 4, 1>}, {pipeline_mode = #tpu.pipeline_mode<synchronous>, transform_indices = @transform_3, window_bounds = array<i64: 9, 16, 4>}, {transform_indices = @transform_4, window_bounds = array<i64: 1, 20, 256>}]} {
    %c0 = arith.constant 0 : index
    %c0_0 = arith.constant 0 : index
    %c0_1 = arith.constant 0 : index
    %0 = vector.load %arg1[%c0, %c0_0, %c0_1] : memref<1x4x256xf32, #tpu.memory_space<vmem>>, vector<1x4x256xf32>
    %1 = vector.shape_cast %0 : vector<1x4x256xf32> to vector<4x256xf32>
    %c0_2 = arith.constant 0 : index
    %c0_3 = arith.constant 0 : index
    %2 = vector.load %arg2[%c0_2, %c0_3] : memref<4x1xf32, #tpu.memory_space<vmem>>, vector<4x1xf32>
    %3 = vector.broadcast %2 : vector<4x1xf32> to vector<4x256xf32>
    %4 = arith.mulf %1, %3 : vector<4x256xf32>
    %c0_4 = arith.constant 0 : index
    %c0_5 = arith.constant 0 : index
    %5 = vector.load %arg3[%c0_4, %c0_5] : memref<4x1xf32, #tpu.memory_space<vmem>>, vector<4x1xf32>
    %6 = vector.broadcast %5 : vector<4x1xf32> to vector<4x256xf32>
    %7 = arith.addf %4, %6 : vector<4x256xf32>
    %cst = arith.constant 0.000000e+00 : f32
    %8 = vector.broadcast %cst : f32 to vector<4x256xf32>
    %9 = arith.maximumf %7, %8 : vector<4x256xf32>
    %10 = tpu.iota {dimensions = array<i32: 1>} : vector<1x256xi32>
    %c16_i32 = arith.constant 16 : i32
    %c0_i32 = arith.constant 0 : i32
    %11 = arith.cmpi eq, %c16_i32, %c0_i32 : i32
    %c1_i32 = arith.constant 1 : i32
    %12 = arith.select %11, %c1_i32, %c16_i32 : i32
    %13 = vector.broadcast %12 : i32 to vector<1x256xi32>
    %14 = arith.remsi %10, %13 : vector<1x256xi32>
    %c0_i32_6 = arith.constant 0 : i32
    %15 = vector.broadcast %c0_i32_6 : i32 to vector<1x256xi32>
    %16 = arith.cmpi ne, %14, %15 : vector<1x256xi32>
    %c0_i32_7 = arith.constant 0 : i32
    %17 = vector.broadcast %c0_i32_7 : i32 to vector<1x256xi32>
    %18 = arith.cmpi slt, %14, %17 : vector<1x256xi32>
    %c0_i32_8 = arith.constant 0 : i32
    %19 = arith.cmpi slt, %12, %c0_i32_8 : i32
    %20 = vector.broadcast %19 : i1 to vector<1x256xi1>
    %21 = vector.broadcast %20 : vector<1x256xi1> to vector<1x256xi1>
    %22 = arith.xori %18, %21 : vector<1x256xi1>
    %23 = arith.andi %22, %16 : vector<1x256xi1>
    %24 = vector.broadcast %12 : i32 to vector<1x256xi32>
    %25 = arith.addi %14, %24 : vector<1x256xi32>
    %26 = arith.select %23, %25, %14 : vector<1x256xi1>, vector<1x256xi32>
    %c0_i32_9 = arith.constant 0 : i32
    %27 = vector.broadcast %c0_i32_9 : i32 to vector<1x256xi32>
    %28 = arith.cmpi sgt, %26, %27 : vector<1x256xi32>
    %c15_i32 = arith.constant 15 : i32
    %29 = vector.broadcast %c15_i32 : i32 to vector<1x256xi32>
    %30 = arith.cmpi slt, %26, %29 : vector<1x256xi32>
    %cst_10 = arith.constant 0.000000e+00 : f32
    %31 = vector.broadcast %cst_10 : f32 to vector<16x256xf32>
    %cst_11 = arith.constant 0.000000e+00 : f32
    %32 = vector.broadcast %cst_11 : f32 to vector<4x17xf32>
    %33 = vector.extract_strided_slice %9 {offsets = [0, 0], sizes = [4, 239], strides = [1, 1]} : vector<4x256xf32> to vector<4x239xf32>
    %34 = tpu.concatenate %32, %33 in 1 : vector<4x17xf32>, vector<4x239xf32> -> vector<4x256xf32>
    %cst_12 = arith.constant 0.000000e+00 : f32
    %35 = vector.shape_cast %28 : vector<1x256xi1> to vector<1x256xi1>
    %36 = vector.broadcast %35 : vector<1x256xi1> to vector<4x256xi1>
    %37 = vector.broadcast %cst_12 : f32 to vector<4x256xf32>
    %38 = arith.select %36, %34, %37 : vector<4x256xi1>, vector<4x256xf32>
    %c0_13 = arith.constant 0 : index
    %c0_14 = arith.constant 0 : index
    %c0_15 = arith.constant 0 : index
    %39 = vector.load %arg4[%c0_13, %c0_14, %c0_15] : memref<9x16x4xf32, #tpu.memory_space<vmem>>, vector<1x16x4xf32>
    %40 = vector.shape_cast %39 : vector<1x16x4xf32> to vector<16x4xf32>
    %cst_16 = arith.constant dense<0.000000e+00> : vector<16x256xf32>
    %41 = tpu.matmul %40, %38, %cst_16 {dimension_numbers = #tpu.dot_dimension_numbers<[1], [0], [0], [1], [0, 0, 1, 1], [], []>} : vector<16x4xf32>, vector<4x256xf32>, vector<16x256xf32> -> vector<16x256xf32>
    %42 = arith.addf %31, %41 : vector<16x256xf32>
    %cst_17 = arith.constant 0.000000e+00 : f32
    %43 = vector.broadcast %cst_17 : f32 to vector<4x16xf32>
    %44 = vector.extract_strided_slice %9 {offsets = [0, 0], sizes = [4, 240], strides = [1, 1]} : vector<4x256xf32> to vector<4x240xf32>
    %45 = tpu.concatenate %43, %44 in 1 : vector<4x16xf32>, vector<4x240xf32> -> vector<4x256xf32>
    %c1 = arith.constant 1 : index
    %c0_18 = arith.constant 0 : index
    %c0_19 = arith.constant 0 : index
    %46 = vector.load %arg4[%c1, %c0_18, %c0_19] : memref<9x16x4xf32, #tpu.memory_space<vmem>>, vector<1x16x4xf32>
    %47 = vector.shape_cast %46 : vector<1x16x4xf32> to vector<16x4xf32>
    %cst_20 = arith.constant dense<0.000000e+00> : vector<16x256xf32>
    %48 = tpu.matmul %47, %45, %cst_20 {dimension_numbers = #tpu.dot_dimension_numbers<[1], [0], [0], [1], [0, 0, 1, 1], [], []>} : vector<16x4xf32>, vector<4x256xf32>, vector<16x256xf32> -> vector<16x256xf32>
    %49 = arith.addf %42, %48 : vector<16x256xf32>
    %cst_21 = arith.constant 0.000000e+00 : f32
    %50 = vector.broadcast %cst_21 : f32 to vector<4x15xf32>
    %51 = vector.extract_strided_slice %9 {offsets = [0, 0], sizes = [4, 241], strides = [1, 1]} : vector<4x256xf32> to vector<4x241xf32>
    %52 = tpu.concatenate %50, %51 in 1 : vector<4x15xf32>, vector<4x241xf32> -> vector<4x256xf32>
    %cst_22 = arith.constant 0.000000e+00 : f32
    %53 = vector.shape_cast %30 : vector<1x256xi1> to vector<1x256xi1>
    %54 = vector.broadcast %53 : vector<1x256xi1> to vector<4x256xi1>
    %55 = vector.broadcast %cst_22 : f32 to vector<4x256xf32>
    %56 = arith.select %54, %52, %55 : vector<4x256xi1>, vector<4x256xf32>
    %c2 = arith.constant 2 : index
    %c0_23 = arith.constant 0 : index
    %c0_24 = arith.constant 0 : index
    %57 = vector.load %arg4[%c2, %c0_23, %c0_24] : memref<9x16x4xf32, #tpu.memory_space<vmem>>, vector<1x16x4xf32>
    %58 = vector.shape_cast %57 : vector<1x16x4xf32> to vector<16x4xf32>
    %cst_25 = arith.constant dense<0.000000e+00> : vector<16x256xf32>
    %59 = tpu.matmul %58, %56, %cst_25 {dimension_numbers = #tpu.dot_dimension_numbers<[1], [0], [0], [1], [0, 0, 1, 1], [], []>} : vector<16x4xf32>, vector<4x256xf32>, vector<16x256xf32> -> vector<16x256xf32>
    %60 = arith.addf %49, %59 : vector<16x256xf32>
    %cst_26 = arith.constant 0.000000e+00 : f32
    %61 = vector.broadcast %cst_26 : f32 to vector<4x1xf32>
    %62 = vector.extract_strided_slice %9 {offsets = [0, 0], sizes = [4, 255], strides = [1, 1]} : vector<4x256xf32> to vector<4x255xf32>
    %63 = tpu.concatenate %61, %62 in 1 : vector<4x1xf32>, vector<4x255xf32> -> vector<4x256xf32>
    %cst_27 = arith.constant 0.000000e+00 : f32
    %64 = vector.shape_cast %28 : vector<1x256xi1> to vector<1x256xi1>
    %65 = vector.broadcast %64 : vector<1x256xi1> to vector<4x256xi1>
    %66 = vector.broadcast %cst_27 : f32 to vector<4x256xf32>
    %67 = arith.select %65, %63, %66 : vector<4x256xi1>, vector<4x256xf32>
    %c3 = arith.constant 3 : index
    %c0_28 = arith.constant 0 : index
    %c0_29 = arith.constant 0 : index
    %68 = vector.load %arg4[%c3, %c0_28, %c0_29] : memref<9x16x4xf32, #tpu.memory_space<vmem>>, vector<1x16x4xf32>
    %69 = vector.shape_cast %68 : vector<1x16x4xf32> to vector<16x4xf32>
    %cst_30 = arith.constant dense<0.000000e+00> : vector<16x256xf32>
    %70 = tpu.matmul %69, %67, %cst_30 {dimension_numbers = #tpu.dot_dimension_numbers<[1], [0], [0], [1], [0, 0, 1, 1], [], []>} : vector<16x4xf32>, vector<4x256xf32>, vector<16x256xf32> -> vector<16x256xf32>
    %71 = arith.addf %60, %70 : vector<16x256xf32>
    %c4 = arith.constant 4 : index
    %c0_31 = arith.constant 0 : index
    %c0_32 = arith.constant 0 : index
    %72 = vector.load %arg4[%c4, %c0_31, %c0_32] : memref<9x16x4xf32, #tpu.memory_space<vmem>>, vector<1x16x4xf32>
    %73 = vector.shape_cast %72 : vector<1x16x4xf32> to vector<16x4xf32>
    %cst_33 = arith.constant dense<0.000000e+00> : vector<16x256xf32>
    %74 = tpu.matmul %73, %9, %cst_33 {dimension_numbers = #tpu.dot_dimension_numbers<[1], [0], [0], [1], [0, 0, 1, 1], [], []>} : vector<16x4xf32>, vector<4x256xf32>, vector<16x256xf32> -> vector<16x256xf32>
    %75 = arith.addf %71, %74 : vector<16x256xf32>
    %cst_34 = arith.constant 0.000000e+00 : f32
    %76 = vector.broadcast %cst_34 : f32 to vector<4x1xf32>
    %77 = vector.extract_strided_slice %9 {offsets = [0, 1], sizes = [4, 255], strides = [1, 1]} : vector<4x256xf32> to vector<4x255xf32>
    %78 = tpu.concatenate %77, %76 in 1 : vector<4x255xf32>, vector<4x1xf32> -> vector<4x256xf32>
    %cst_35 = arith.constant 0.000000e+00 : f32
    %79 = vector.shape_cast %30 : vector<1x256xi1> to vector<1x256xi1>
    %80 = vector.broadcast %79 : vector<1x256xi1> to vector<4x256xi1>
    %81 = vector.broadcast %cst_35 : f32 to vector<4x256xf32>
    %82 = arith.select %80, %78, %81 : vector<4x256xi1>, vector<4x256xf32>
    %c5 = arith.constant 5 : index
    %c0_36 = arith.constant 0 : index
    %c0_37 = arith.constant 0 : index
    %83 = vector.load %arg4[%c5, %c0_36, %c0_37] : memref<9x16x4xf32, #tpu.memory_space<vmem>>, vector<1x16x4xf32>
    %84 = vector.shape_cast %83 : vector<1x16x4xf32> to vector<16x4xf32>
    %cst_38 = arith.constant dense<0.000000e+00> : vector<16x256xf32>
    %85 = tpu.matmul %84, %82, %cst_38 {dimension_numbers = #tpu.dot_dimension_numbers<[1], [0], [0], [1], [0, 0, 1, 1], [], []>} : vector<16x4xf32>, vector<4x256xf32>, vector<16x256xf32> -> vector<16x256xf32>
    %86 = arith.addf %75, %85 : vector<16x256xf32>
    %cst_39 = arith.constant 0.000000e+00 : f32
    %87 = vector.broadcast %cst_39 : f32 to vector<4x15xf32>
    %88 = vector.extract_strided_slice %9 {offsets = [0, 15], sizes = [4, 241], strides = [1, 1]} : vector<4x256xf32> to vector<4x241xf32>
    %89 = tpu.concatenate %88, %87 in 1 : vector<4x241xf32>, vector<4x15xf32> -> vector<4x256xf32>
    %cst_40 = arith.constant 0.000000e+00 : f32
    %90 = vector.shape_cast %28 : vector<1x256xi1> to vector<1x256xi1>
    %91 = vector.broadcast %90 : vector<1x256xi1> to vector<4x256xi1>
    %92 = vector.broadcast %cst_40 : f32 to vector<4x256xf32>
    %93 = arith.select %91, %89, %92 : vector<4x256xi1>, vector<4x256xf32>
    %c6 = arith.constant 6 : index
    %c0_41 = arith.constant 0 : index
    %c0_42 = arith.constant 0 : index
    %94 = vector.load %arg4[%c6, %c0_41, %c0_42] : memref<9x16x4xf32, #tpu.memory_space<vmem>>, vector<1x16x4xf32>
    %95 = vector.shape_cast %94 : vector<1x16x4xf32> to vector<16x4xf32>
    %cst_43 = arith.constant dense<0.000000e+00> : vector<16x256xf32>
    %96 = tpu.matmul %95, %93, %cst_43 {dimension_numbers = #tpu.dot_dimension_numbers<[1], [0], [0], [1], [0, 0, 1, 1], [], []>} : vector<16x4xf32>, vector<4x256xf32>, vector<16x256xf32> -> vector<16x256xf32>
    %97 = arith.addf %86, %96 : vector<16x256xf32>
    %cst_44 = arith.constant 0.000000e+00 : f32
    %98 = vector.broadcast %cst_44 : f32 to vector<4x16xf32>
    %99 = vector.extract_strided_slice %9 {offsets = [0, 16], sizes = [4, 240], strides = [1, 1]} : vector<4x256xf32> to vector<4x240xf32>
    %100 = tpu.concatenate %99, %98 in 1 : vector<4x240xf32>, vector<4x16xf32> -> vector<4x256xf32>
    %c7 = arith.constant 7 : index
    %c0_45 = arith.constant 0 : index
    %c0_46 = arith.constant 0 : index
    %101 = vector.load %arg4[%c7, %c0_45, %c0_46] : memref<9x16x4xf32, #tpu.memory_space<vmem>>, vector<1x16x4xf32>
    %102 = vector.shape_cast %101 : vector<1x16x4xf32> to vector<16x4xf32>
    %cst_47 = arith.constant dense<0.000000e+00> : vector<16x256xf32>
    %103 = tpu.matmul %102, %100, %cst_47 {dimension_numbers = #tpu.dot_dimension_numbers<[1], [0], [0], [1], [0, 0, 1, 1], [], []>} : vector<16x4xf32>, vector<4x256xf32>, vector<16x256xf32> -> vector<16x256xf32>
    %104 = arith.addf %97, %103 : vector<16x256xf32>
    %cst_48 = arith.constant 0.000000e+00 : f32
    %105 = vector.broadcast %cst_48 : f32 to vector<4x17xf32>
    %106 = vector.extract_strided_slice %9 {offsets = [0, 17], sizes = [4, 239], strides = [1, 1]} : vector<4x256xf32> to vector<4x239xf32>
    %107 = tpu.concatenate %106, %105 in 1 : vector<4x239xf32>, vector<4x17xf32> -> vector<4x256xf32>
    %cst_49 = arith.constant 0.000000e+00 : f32
    %108 = vector.shape_cast %30 : vector<1x256xi1> to vector<1x256xi1>
    %109 = vector.broadcast %108 : vector<1x256xi1> to vector<4x256xi1>
    %110 = vector.broadcast %cst_49 : f32 to vector<4x256xf32>
    %111 = arith.select %109, %107, %110 : vector<4x256xi1>, vector<4x256xf32>
    %c8 = arith.constant 8 : index
    %c0_50 = arith.constant 0 : index
    %c0_51 = arith.constant 0 : index
    %112 = vector.load %arg4[%c8, %c0_50, %c0_51] : memref<9x16x4xf32, #tpu.memory_space<vmem>>, vector<1x16x4xf32>
    %113 = vector.shape_cast %112 : vector<1x16x4xf32> to vector<16x4xf32>
    %cst_52 = arith.constant dense<0.000000e+00> : vector<16x256xf32>
    %114 = tpu.matmul %113, %111, %cst_52 {dimension_numbers = #tpu.dot_dimension_numbers<[1], [0], [0], [1], [0, 0, 1, 1], [], []>} : vector<16x4xf32>, vector<4x256xf32>, vector<16x256xf32> -> vector<16x256xf32>
    %115 = arith.addf %104, %114 : vector<16x256xf32>
    %116 = tpu.concatenate %1, %115 in 0 : vector<4x256xf32>, vector<16x256xf32> -> vector<20x256xf32>
    %c0_53 = arith.constant 0 : index
    %c0_54 = arith.constant 0 : index
    %c0_55 = arith.constant 0 : index
    %117 = vector.load %arg5[%c0_53, %c0_54, %c0_55] : memref<1x20x256xf32, #tpu.memory_space<vmem>>, vector<1x20x256xf32>
    %118 = vector.shape_cast %117 : vector<1x20x256xf32> to vector<20x256xf32>
    %119 = vector.shape_cast %116 : vector<20x256xf32> to vector<1x20x256xf32>
    tpu.vector_store %arg5[%c0_53, %c0_54, %c0_55], %119 {strides = array<i32>} : memref<1x20x256xf32, #tpu.memory_space<vmem>>, vector<1x20x256xf32>,
    return
  }
  func.func @transform_0(%arg0: i32) -> (i32, i32, i32) {
    %c0_i32 = arith.constant 0 : i32
    %c0_i32_0 = arith.constant 0 : i32
    %c0_i32_1 = arith.constant 0 : i32
    return %arg0, %c0_i32, %c0_i32_0 : i32, i32, i32
  }
  func.func @transform_1(%arg0: i32) -> (i32, i32) {
    %c0_i32 = arith.constant 0 : i32
    %c0_i32_0 = arith.constant 0 : i32
    %c0_i32_1 = arith.constant 0 : i32
    return %c0_i32, %c0_i32_0 : i32, i32
  }
  func.func @transform_2(%arg0: i32) -> (i32, i32) {
    %c0_i32 = arith.constant 0 : i32
    %c0_i32_0 = arith.constant 0 : i32
    %c0_i32_1 = arith.constant 0 : i32
    return %c0_i32, %c0_i32_0 : i32, i32
  }
  func.func @transform_3(%arg0: i32) -> (i32, i32, i32) {
    %c0_i32 = arith.constant 0 : i32
    %c0_i32_0 = arith.constant 0 : i32
    %c0_i32_1 = arith.constant 0 : i32
    %c0_i32_2 = arith.constant 0 : i32
    return %c0_i32, %c0_i32_0, %c0_i32_1 : i32, i32, i32
  }
  func.func @transform_4(%arg0: i32) -> (i32, i32, i32) {
    %c0_i32 = arith.constant 0 : i32
    %c0_i32_0 = arith.constant 0 : i32
    %c0_i32_1 = arith.constant 0 : i32
    return %arg0, %c0_i32, %c0_i32_0 : i32, i32, i32
  }
}

</mosaic_0001>

<bundles_post_ra>
// kernel: tpu_custom_call.1
= control target key start
LH: loop header
LB: loop body
LE: loop exit
PB: predicated region body
PF: predicated region fallthrough
CT: control target
= control target key end

     0   :  { %s1449_s15 = smov 0   ;;  %s1670_s0 = inlined_call_operand.vmem [shape: f32[2,4,256], index: 0, kind: input, shape index: {}]   ;;  %s1671_s1 = inlined_call_operand.vmem [shape: f32[4,1], index: 1, kind: input, shape index: {}]   ;;  %s1672_s2 = inlined_call_operand.vmem [shape: f32[4,1], index: 2, kind: input, shape index: {}]   ;;  %s1673_s3 = inlined_call_operand.vmem [shape: f32[9,16,4], index: 3, kind: input, shape index: {}]   ;;  %s1674_s4 = inlined_call_operand.vmem [shape: f32[2,20,256], index: 4, kind: output, shape index: {}]  }
   0x1 LB: > { %s1286_s16 = sadd.s32 4294967295, %s1411_s15   ;;  %p1290_p0 = scmp.ge.s32.totalorder %s1411_s15, 1  ;;  %s1411_s15 = sphi %s1449_s15, %s14_s15  }
   0x2   : > { %p162_p1 = scmp.lt.s32.totalorder %s1411_s15, 3 }
   0x4   : > { %p163_p2 = pnand %p1290_p0, %p162_p1 }
   0x5   : > { %v199_v0 = vld [vmem:[%s1671_s1] sm:$0xf] (!%p163_p2)  ;;  %v1413_v1 = vmov (!%p163_p2), 0   ;;  %p188_p3 = scmp.lt.s32.totalorder (!%p163_p2), %s1286_s16, 1  ;;  %v1414_v3 = vmov (!%p163_p2), 839922192   ;;  %v207_v5 = vlaneseq (!%p163_p2) }
   0x6   : > { %166 = sbr.rel (%p163_p2) target bundleno = 522 (0x20a), region = 36  ;;  %1403 = vset.pattern.permute.xlu0 (!%p163_p2), %v1413_v1  ;;  %v213_v2 = vld [vmem:[%s1672_s2] sm:$0xf] (!%p163_p2)  ;;  %v205_v4 = vunpack.c.l.s4 (!%p163_p2), %v1414_v3  ;;  %v1415_v13 = vmov (!%p163_p2), 0.0   ;;  %vm296_vm0 = vcmask (!%p163_p2), 1043456   ;;  %s1416_s25 = smov (!%p163_p2), 17  }
   0x7   : > { %202 = vperm.xlu0 (!%p163_p2), %1403, %v199_v0   ;;  %v208_v7 = vshrl.u32 (!%p163_p2), %v207_v5, 7  ;;  %366 = vmatprep.mubr.f32.mxu1 (!%p163_p2), %v1415_v13  ;;  %s1417_s26 = smov (!%p163_p2), 16   ;;  %vm289_vm1 = vcmask (!%p163_p2), 31744   ;;  %v1316_v19 = vld [vmem:[%s1673_s3 + $0x40] sm:$0xff] (!%p163_p2)  ;;  %s1418_s29 = smov (!%p163_p2), 127   ;;  %v229_v20 = vand.u32 (!%p163_p2), 127, %v207_v5 }
   0x8   : > { %v206_v6 = vunpack.c.0.s8 (!%p163_p2), %v205_v4  ;;  %763 = vmatprep.mubr.f32.mxu0 (!%p163_p2), %v1415_v13  ;;  %s1419_s30 = smov (!%p163_p2), 15   ;;  %s1420_s5 = smov (!%p163_p2), 113   ;;  %vm784_vm2 = vcmask (!%p163_p2), 1039360   ;;  %vm282_vm4 = vcmask (!%p163_p2), 130048   ;;  %v1294_v31 = vld [vmem:[%s1673_s3 + $0x10] sm:$0xff] (!%p163_p2)  ;;  %vm265_vm5 = vcmask (!%p163_p2), 138240  }
   0x9   : > { %s1421_s6 = smov (!%p163_p2), 1   ;;  %s1422_s7 = smov (!%p163_p2), 112   ;;  %v230_v21 = vadd.s32 (!%p163_p2), 128, %v229_v20  ;;  %v235_v28 = vand.u32 (!%p163_p2), 15, %v229_v20  ;;  %v1295_v40 = vld [vmem:[%s1673_s3 + $0x18] sm:$0xff] (!%p163_p2)  ;;  %vm891_vm8 = vcmask (!%p163_p2), 924672  }
   0xa   : > { %v209_v8 = vsub.s32 (!%p163_p2), %v206_v6, %v208_v7  ;;  %s1423_s8 = smov (!%p163_p2), 111   ;;  %v276_v48 = vld [vmem:[%s1673_s3] sm:$0xff] (!%p163_p2)  ;;  %v1322_v49 = vld [vmem:[%s1673_s3 + $0x50] sm:$0xff] (!%p163_p2)  ;;  %vm472_vm10 = vcmask (!%p163_p2), 121856   ;;  %v277_v56 = vld [vmem:[%s1673_s3 + $0x8] sm:$0xff] (!%p163_p2)  ;;  %vm998_vm11 = vcmask (!%p163_p2), 916480  }
   0xb   : > { %216 = vperm.xlu0 (!%p163_p2), %1403, %v213_v2   ;;  %v242_v22 = vand.u32 (!%p163_p2), 15, %v230_v21  ;;  %vm1523_vm7 = vcmp.gt.s32.totalorder (!%p163_p2), %v235_v28, 0  ;;  %vm1537_vm9 = vcmp.lt.s32.totalorder (!%p163_p2), %v235_v28, 15  ;;  %v1323_v57 = vld [vmem:[%s1673_s3 + $0x58] sm:$0xff] (!%p163_p2)  ;;  %v1304_v63 = vld [vmem:[%s1673_s3 + $0x20] sm:$0xff] (!%p163_p2)  ;;  %vm583_vm12 = vcmask (!%p163_p2), 7168  }
   0xc   : > { %v1328_v0 = vld [vmem:[%s1673_s3 + $0x60] sm:$0xff] (!%p163_p2)  ;;  %vm1101_vm13 = vcmask (!%p163_p2), 908288   ;;  %v1305_v7 = vld [vmem:[%s1673_s3 + $0x28] sm:$0xff] (!%p163_p2) }
   0xd   : > { %s1684_s16 = smov (!%p188_p3, %s1286_s16), 1  ;;  %vm1505_vm3 = vcmp.lt.s32.totalorder %v242_v22, 15  ;;  %vm1518_vm6 = vcmp.gt.s32.totalorder %v242_v22, 0  ;;  %v1317_v25 = vld [vmem:[%s1673_s3 + $0x48] sm:$0xff] }
   0xe   : > { %s1348_s21 = sshll.u32 %s1684_s16, 3 }
   0xf   : > { %s192_s24 = scalar_lea.vmem %s1670_s0, %s1348_s21  ;;  %s1383_s21 = smul.u32 48, %s1684_s16 }
  0x10   : > { %v1469_v11 = vld [vmem:[%s192_s24] sm:$0xff] }
  0x11   : > { %s197_s24 = scalar_lea.vmem %s1674_s4, %s1383_s21 }
  0x86   : > { %v203_v9 = vpop.permute.xlu0 %202 }
  0x87   : > { %v210_v10 = vrot.slane %v203_v9, %v209_v8 }
  0x89   : > { %v212_v14 = vmul.f32 %v210_v10, %v1469_v11 }
  0x8a   : > { %v217_v12 = vpop.permute.xlu0 %216 }
  0x8b   : > { %v224_v15 = vrot.slane %v217_v12, %v209_v8  ;;  %v1329_v8 = vld [vmem:[%s1673_s3 + $0x68] sm:$0xff] }
  0x8d   : > { %v226_v16 = vadd.f32 %v224_v15, %v212_v14 }
  0x8f   : > { %v1474_v17 = vmax.f32 %v226_v16, 0.0  ;;  %v1310_v16 = vld [vmem:[%s1673_s3 + $0x30] sm:$0xff] }
  0x91   : > { %261 = vrot.lane.b32.xlu0 %v1474_v17, %s1416_s25  ;;  %278 = vrot.lane.b32.xlu1 %v1474_v17, %s1417_s26  ;;  %v1480_v18 = vcombine.high %v1474_v17, %v1474_v17 }
  0x93   : > { %1318 = vmatprep.subr.msk.mxu0 %vm296_vm0, %v1480_v18 }
  0x94   : > { %1319 = vmatpush1.msk.msra.mxu0 %vm296_vm0, %v1474_v17 }
  0x95   : > { %782 = vrot.lane.b32.xlu0 %v1480_v18, %s1418_s29  ;;  %280 = vrot.lane.b32.xlu1 %v1480_v18, %s1417_s26 }
  0x96   : > { %1320 = vmatmul.mubr.msk.f32.vlgmr.msra.gmra.mrb[0].mxu0 %vm289_vm1, %v1316_v19  ;;  %v1334_v19 = vld [vmem:[%s1673_s3 + $0x70] sm:$0xff] }
  0x97   : > { %870 = vmatprep.mubr.f32.mxu0 %v1415_v13 }
  0x99   : > { %468 = vrot.lane.b32.xlu0 %v1474_v17, %s1419_s30  ;;  %263 = vrot.lane.b32.xlu1 %v1480_v18, %s1416_s25 }
  0x9d   : > { %889 = vrot.lane.b32.xlu0 %v1480_v18, %s1420_s5  ;;  %780 = vrot.lane.b32.xlu1 %v1474_v17, %s1418_s29 }
  0xa1   : > { %579 = vrot.lane.b32.xlu0 %v1474_v17, %s1421_s6  ;;  %470 = vrot.lane.b32.xlu1 %v1480_v18, %s1419_s30 }
  0xa5   : > { %996 = vrot.lane.b32.xlu0 %v1480_v18, %s1422_s7  ;;  %887 = vrot.lane.b32.xlu1 %v1474_v17, %s1420_s5 }
  0xa9   : > { %1099 = vrot.lane.b32.xlu0 %v1480_v18, %s1423_s8  ;;  %581 = vrot.lane.b32.xlu1 %v1480_v18, %s1421_s6 }
  0xad   : > { %994 = vrot.lane.b32.xlu1 %v1474_v17, %s1422_s7 }
  0xb1   : > { %1097 = vrot.lane.b32.xlu1 %v1474_v17, %s1423_s8 }
 0x103   : > { %v262_v23 = vpop.permute.xlu0 %261  ;;  %v279_v24 = vpop.permute.xlu1 %278 }
 0x104   : > { %v285_v33 = vsel %vm282_vm4, 0.0, %v279_v24  ;;  %v269_v38 = vsel %vm265_vm5, 0.0, %v262_v23 }
 0x105   : > { %v274_v42 = vsel %vm1523_vm7, %v269_v38, 0.0 }
 0x107   : > { %v783_v26 = vpop.permute.xlu0 %782  ;;  %v281_v27 = vpop.permute.xlu1 %280 }
 0x108   : > { %v788_v29 = vsel %vm784_vm2, %v783_v26, 0.0  ;;  %v283_v30 = vsel %vm282_vm4, %v279_v24, %v281_v27 }
 0x109   : > { %v790_v32 = vsel %vm1505_vm3, %v788_v29, 0.0  ;;  %1296 = vmatprep.subr.msk.mxu1 %vm296_vm0, %v283_v30 }
 0x10a   : > { %1297 = vmatpush1.msk.msra.mxu1 %vm296_vm0, %v285_v33  ;;  %1324 = vmatprep.subr.msk.mxu0 %vm296_vm0, %v790_v32 }
 0x10b   : > { %v469_v35 = vpop.permute.xlu0 %468  ;;  %1298 = vmatmul.mubr.msk.f32.vlgmr.msra.gmra.mrb[0].mxu1 %vm289_vm1, %v1294_v31  ;;  %v264_v36 = vpop.permute.xlu1 %263 }
 0x10c   : > { %v266_v39 = vsel %vm265_vm5, %v262_v23, %v264_v36  ;;  %372 = vmatprep.mubr.f32.mxu1 %v1415_v13  ;;  %v476_v54 = vsel %vm472_vm10, 0.0, %v469_v35  ;;  %v1335_v23 = vld [vmem:[%s1673_s3 + $0x78] sm:$0xff] }
 0x10d   : > { %v275_v41 = vsel %vm1518_vm6, %v266_v39, 0.0  ;;  %v481_v59 = vsel %vm1537_vm9, %v476_v54, 0.0 }
 0x10e   : > { %1300 = vmatprep.subr.msk.mxu1 %vm296_vm0, %v275_v41 }
 0x10f   : > { %v890_v43 = vpop.permute.xlu0 %889  ;;  %1299 = vmatmul.mubr.msk.f32.gmra.mrb[2].mxu1 %vm289_vm1, %v1295_v40  ;;  %v781_v44 = vpop.permute.xlu1 %780 }
 0x110   : > { %v895_v46 = vsel %vm891_vm8, %v890_v43, 0.0  ;;  %1301 = vmatpush1.msk.msra.mxu1 %vm296_vm0, %v274_v42  ;;  %v785_v47 = vsel %vm784_vm2, %v781_v44, %v783_v26  ;;  %455 = vmatprep.mubr.f32.mxu1 %v1415_v13  ;;  %v1341_v26 = vld [vmem:[%s1673_s3 + $0x88] sm:$0xff] }
 0x111   : > { %v897_v50 = vsel %vm1518_vm6, %v895_v46, 0.0  ;;  %v789_v51 = vsel %vm1537_vm9, %v785_v47, 0.0 }
 0x112   : > { %1325 = vmatpush1.msk.msra.mxu0 %vm296_vm0, %v789_v51 }
 0x113   : > { %v580_v52 = vpop.permute.xlu0 %579  ;;  %1302 = vmatmul.mubr.msk.f32.vlgmr.msra.gmra.mrb[0].mxu1 %vm289_vm1, %v276_v48  ;;  %v471_v53 = vpop.permute.xlu1 %470  ;;  %1326 = vmatmul.mubr.msk.f32.vlgmr.msra.gmra.mrb[0].mxu0 %vm289_vm1, %v1322_v49 }
 0x114   : > { %v473_v55 = vsel %vm472_vm10, %v469_v35, %v471_v53  ;;  %1330 = vmatprep.subr.msk.mxu0 %vm296_vm0, %v897_v50  ;;  %461 = vmatprep.mubr.f32.mxu1 %v1415_v13  ;;  %v587_v5 = vsel %vm583_vm12, 0.0, %v580_v52 }
 0x115   : > { %v482_v58 = vsel %vm1505_vm3, %v473_v55, 0.0  ;;  %876 = vmatprep.mubr.f32.mxu0 %v1415_v13  ;;  %v588_v12 = vsel %vm1523_vm7, %v587_v5, 0.0 }
 0x116   : > { %1306 = vmatprep.subr.msk.mxu1 %vm296_vm0, %v482_v58 }
 0x117   : > { %v997_v60 = vpop.permute.xlu0 %996  ;;  %1303 = vmatmul.mubr.msk.f32.gmra.mrb[2].mxu1 %vm289_vm1, %v277_v56  ;;  %v888_v61 = vpop.permute.xlu1 %887  ;;  %1327 = vmatmul.mubr.msk.f32.gmra.mrb[2].mxu0 %vm289_vm1, %v1323_v57 }
 0x118   : > { %1307 = vmatpush1.msk.msra.mxu1 %vm296_vm0, %v481_v59  ;;  %v892_v62 = vsel %vm891_vm8, %v888_v61, %v890_v43  ;;  %562 = vmatprep.mubr.f32.mxu1 %v1415_v13  ;;  %v1001_v2 = vsel %vm998_vm11, %v997_v60, 0.0 }
 0x119   : > { %v896_v1 = vsel %vm1523_vm7, %v892_v62, 0.0  ;;  %977 = vmatprep.mubr.f32.mxu0 %v1415_v13 }
 0x11a   : > { %1331 = vmatpush1.msk.msra.mxu0 %vm296_vm0, %v896_v1 }
 0x11b   : > { %v1100_v3 = vpop.permute.xlu0 %1099  ;;  %1308 = vmatmul.mubr.msk.f32.vlgmr.msra.gmra.mrb[0].mxu1 %vm289_vm1, %v1304_v63  ;;  %v582_v4 = vpop.permute.xlu1 %581  ;;  %1332 = vmatmul.mubr.msk.f32.vlgmr.msra.gmra.mrb[0].mxu0 %vm289_vm1, %v1328_v0 }
 0x11c   : > { %v584_v6 = vsel %vm583_vm12, %v580_v52, %v582_v4  ;;  %1336 = vmatprep.subr.msk.mxu0 %vm296_vm0, %v1001_v2  ;;  %568 = vmatprep.mubr.f32.mxu1 %v1415_v13  ;;  %v1105_v10 = vsel %vm1101_vm13, %v1100_v3, 0.0 }
 0x11d   : > { %v589_v9 = vsel %vm1518_vm6, %v584_v6, 0.0  ;;  %983 = vmatprep.mubr.f32.mxu0 %v1415_v13  ;;  %v1107_v20 = vsel %vm1505_vm3, %v1105_v10, 0.0 }
 0x11e   : > { %1312 = vmatprep.subr.msk.mxu1 %vm296_vm0, %v589_v9 }
 0x11f   : > { %1309 = vmatmul.mubr.msk.f32.gmra.mrb[2].mxu1 %vm289_vm1, %v1305_v7  ;;  %v995_v14 = vpop.permute.xlu1 %994  ;;  %1333 = vmatmul.mubr.msk.f32.gmra.mrb[2].mxu0 %vm289_vm1, %v1329_v8 }
 0x120   : > { %1313 = vmatpush1.msk.msra.mxu1 %vm296_vm0, %v588_v12  ;;  %v999_v15 = vsel %vm998_vm11, %v995_v14, %v997_v60  ;;  %669 = vmatprep.mubr.f32.mxu1 %v1415_v13 }
 0x121   : > { %1349 = vmatprep.subr.msk.mxu1 %vm296_vm0, %v1480_v18  ;;  %1337 = vmatpush1.msk.msra.mxu0 %vm296_vm0, %v999_v15  ;;  %v1311_v18 = vld [vmem:[%s1673_s3 + $0x38] sm:$0xff] }
 0x122   : > { %1080 = vmatprep.mubr.f32.mxu0 %v1415_v13  ;;  %1342 = vmatprep.subr.msk.mxu0 %vm296_vm0, %v1107_v20 }
 0x123   : > { %1314 = vmatmul.mubr.msk.f32.vlgmr.msra.gmra.mrb[0].mxu1 %vm289_vm1, %v1310_v16  ;;  %v1098_v21 = vpop.permute.xlu1 %1097  ;;  %1338 = vmatmul.mubr.msk.f32.vlgmr.msra.gmra.mrb[0].mxu0 %vm289_vm1, %v1334_v19 }
 0x124   : > { %1350 = vmatpush1.msk.msra.mxu1 %vm296_vm0, %v1474_v17  ;;  %v1102_v22 = vsel %vm1101_vm13, %v1098_v21, %v1100_v3  ;;  %675 = vmatprep.mubr.f32.mxu1 %v1415_v13  ;;  %v1340_v17 = vld [vmem:[%s1673_s3 + $0x80] sm:$0xff] }
 0x125   : > { %v1106_v24 = vsel %vm1537_vm9, %v1102_v22, 0.0  ;;  %1086 = vmatprep.mubr.f32.mxu0 %v1415_v13 }
 0x126   : > { %1343 = vmatpush1.msk.msra.mxu0 %vm296_vm0, %v1106_v24 }
 0x127   : > { %1315 = vmatmul.mubr.msk.f32.gmra.mrb[2].mxu1 %vm289_vm1, %v1311_v18  ;;  %1339 = vmatmul.mubr.msk.f32.gmra.mrb[2].mxu0 %vm289_vm1, %v1335_v23 }
 0x128   : > { %1187 = vmatprep.mubr.f32.mxu0 %v1415_v13  ;;  %769 = vmatprep.mubr.f32.mxu1 %v1415_v13 }
 0x12b   : > { %1344 = vmatmul.mubr.msk.f32.vlgmr.msra.gmra.mrb[0].mxu0 %vm289_vm1, %v1340_v17 }
 0x12c   : > { %1193 = vmatprep.mubr.f32.mxu0 %v1415_v13  ;;  %v1205_v13 = vcombine.high %v1469_v11, %v1469_v11 }
 0x12f   : > { %1321 = vmatmul.mubr.msk.f32.vlgmr.msra.gmra.mrb[2].mxu1 %vm289_vm1, %v1317_v25  ;;  %1345 = vmatmul.mubr.msk.f32.gmra.mrb[2].mxu0 %vm289_vm1, %v1341_v26 }
 0x1f6   : > { %v671_v27 = vpop.f32.mrb[0].mxu1 }
 0x1f7   : > { %v673_v28 = vpop.f32.mrb[1].mxu1 }
 0x1fe   : > { %v1189_v29 = vpop.f32.mrb[0].mxu0 }
 0x1ff   : > { %v1351_v30 = vadd.f32 %v1189_v29, %v671_v27  ;;  %v1191_v31 = vpop.f32.mrb[1].mxu0 }
 0x200   : > { %v1352_v32 = vadd.f32 %v1191_v31, %v673_v28 }
 0x201   : > { %v1211_v33 = vrot.slane %v1351_v30, 4 }
 0x202   : > { %v1212_v34 = vrot.slane %v1352_v32, 4  ;;  %v771_v35 = vpop.f32.mrb[2].mxu1  ;;  %v1195_v36 = vpop.f32.mrb[2].mxu0 }
 0x203   : > { %v1223_v37 = vsel %vm296_vm0, %v1469_v11, %v1211_v33  ;;  %v1353_v38 = vadd.f32 %v1195_v36, %v771_v35  ;;  %v773_v39 = vpop.f32.mrb[3].mxu1  ;;  %v1197_v40 = vpop.f32.mrb[3].mxu0 }
 0x204   : > { %1225 = vst [vmem:[%s197_s24] sm:$0xff] %v1223_v37  ;;  %v1224_v41 = vsel %vm296_vm0, %v1205_v13, %v1212_v34  ;;  %v1354_v42 = vadd.f32 %v1197_v40, %v773_v39 }
 0x205   : > { %1226 = vst [vmem:[%s197_s24 + $0x8] sm:$0xff] %v1224_v41  ;;  %v1213_v43 = vrot.slane %v1353_v38, 4 }
 0x206   : > { %v1215_v44 = vrot.slane %v1354_v42, 4 }
 0x207   : > { %v1214_v45 = vsel %vm296_vm0, %v1211_v33, %v1213_v43  ;;  %1229 = vst [vmem:[%s197_s24 + $0x20] sm:$0xf] %v1213_v43 }
 0x208   : > { %1227 = vst [vmem:[%s197_s24 + $0x10] sm:$0xff] %v1214_v45  ;;  %v1216_v46 = vsel %vm296_vm0, %v1212_v34, %v1215_v44  ;;  %1230 = vst [vmem:[%s197_s24 + $0x28] sm:$0xf] %v1215_v44 }
 0x209   : > { %1228 = vst [vmem:[%s197_s24 + $0x18] sm:$0xff] %v1216_v46 }
 0x20a PF: > { %s14_s15 = sadd.s32 1, %s1411_s15  }
 0x20b   : > { %p11_p4 = scmp.ge.s32.totalorder %s14_s15, 4  }
 0x20d   :  { %13 = sbr.rel (!%p11_p4) target bundleno = 1 (0x1), region = 74 }

</bundles_post_ra>
